<compile_context>
chip_gen: v7x
topology: tpu7x:2x2x1
jax: 0.10.0
libtpu: 0.0.40
codegen_flags: <defaults>
</compile_context>

<pallas_src>
import functools

import jax
import jax.numpy as jnp
from jax import lax
from jax.experimental import pallas as pl
from jax.experimental.pallas import tpu as pltpu

_LANE_WIDTH = 1024   # lane-dense last dim (multiple of 128)
_SUBLANES = 8        # f32 sublane packing


def _l1_partial_kernel(t_ref, p_ref, out_ref, *, steps, tile_rows, rows_total,
                       need_mask):
    c = pl.program_id(0)   # "parallel" core-split axis
    i = pl.program_id(1)   # "arbitrary" reduction axis

    @pl.when(i == 0)
    def _():
        out_ref[...] = jnp.zeros_like(out_ref)

    # Cast to f32 inside the kernel (inputs stay in their HBM dtype).
    a = jnp.abs(t_ref[...].astype(jnp.float32) - p_ref[...].astype(jnp.float32))

    if need_mask:
        # Zero out rows belonging to partial / replayed boundary blocks.
        block = c * steps + i
        row = block * tile_rows + lax.broadcasted_iota(jnp.int32, a.shape, 0)
        a = jnp.where(row < rows_total, a, 0.0)

    # Fold the block onto an (8, LANE_WIDTH) resident accumulator with pure
    # element-wise VPU adds (no per-step cross-lane reduction).
    out_ref[...] += a.reshape(tile_rows // _SUBLANES, _SUBLANES, a.shape[1]).sum(axis=0)


def l1_loss(true, pred, *, tile_rows=512):
    """mean(|true - pred|) with the heavy reduction done in a Pallas TPU kernel."""
    assert true.shape == pred.shape, "L1Loss expects matching shapes"
    n_elems = true.size
    if n_elems == 0:
        # torch.mean of an empty tensor is NaN.
        return jnp.float32(float("nan"))

    t = true.reshape(-1)
    p = pred.reshape(-1)

    # Pad only when needed so the flat array reshapes to (rows, 1024) with
    # rows a multiple of 8. Zero padding contributes |0 - 0| = 0 to the sum.
    chunk = _SUBLANES * _LANE_WIDTH
    padded = pl.cdiv(n_elems, chunk) * chunk
    if padded != n_elems:
        t = jnp.pad(t, (0, padded - n_elems))
        p = jnp.pad(p, (0, padded - n_elems))

    rows_total = padded // _LANE_WIDTH
    t = t.reshape(rows_total, _LANE_WIDTH)
    p = p.reshape(rows_total, _LANE_WIDTH)

    tr = min(tile_rows, rows_total)                 # multiple of 8, or full dim
    nblocks = pl.cdiv(rows_total, tr)
    ncores = 2 if nblocks >= 2 else 1               # megacore split (v7x / v4 / v5p)
    steps = pl.cdiv(nblocks, ncores)
    need_mask = (ncores * steps * tr) != rows_total

    kernel = functools.partial(
        _l1_partial_kernel,
        steps=steps, tile_rows=tr, rows_total=rows_total, need_mask=need_mask)

    def in_map(c, i):
        # Clamp so replayed tail blocks never DMA out of bounds; their rows
        # are zeroed by the in-kernel mask.
        return (jnp.minimum(c * steps + i, nblocks - 1), 0)

    itemsize = true.dtype.itemsize + pred.dtype.itemsize
    partials = pl.pallas_call(
        kernel,
        out_shape=jax.ShapeDtypeStruct((ncores * _SUBLANES, _LANE_WIDTH),
                                       jnp.float32),
        grid=(ncores, steps),
        in_specs=[
            pl.BlockSpec((tr, _LANE_WIDTH), in_map),
            pl.BlockSpec((tr, _LANE_WIDTH), in_map),
        ],
        out_specs=pl.BlockSpec((_SUBLANES, _LANE_WIDTH), lambda c, i: (c, 0)),
        compiler_params=pltpu.CompilerParams(
            dimension_semantics=("parallel", "arbitrary"),
            vmem_limit_bytes=32 * 1024 * 1024,
        ),
        cost_estimate=pl.CostEstimate(
            flops=3 * n_elems,
            transcendentals=0,
            bytes_accessed=n_elems * itemsize,
        ),
    )(t, p)

    # Tiny final reduction + mean division (divide by the true element count).
    return partials.sum() / jnp.float32(n_elems)


if __name__ == "__main__":
    key = jax.random.PRNGKey(0)
    k_true, k_pred, k_t2, k_p2 = jax.random.split(key, 4)

    # --- Test 1: small NCHW f32 batch (single block, no masking path). ---
    true = jax.random.normal(k_true, (2, 4, 16, 16), dtype=jnp.float32)
    pred = jax.random.normal(k_pred, (2, 4, 16, 16), dtype=jnp.float32)

    out = jax.block_until_ready(l1_loss(true, pred))
    ref = jnp.mean(jnp.abs(true - pred))
    assert jnp.allclose(out, ref, rtol=1e-5, atol=1e-6), (out, ref)

    # --- Test 2: bf16 inputs, ragged size -> exercises pad + mask + 2-way
    #     core split (tile_rows=8 keeps the grid multi-block at small size). ---
    t2 = jax.random.normal(k_t2, (2, 4, 50, 50), dtype=jnp.bfloat16)
    p2 = jax.random.normal(k_p2, (2, 4, 50, 50), dtype=jnp.bfloat16)

    out2 = jax.block_until_ready(l1_loss(t2, p2, tile_rows=8))
    ref2 = jnp.mean(jnp.abs(t2.astype(jnp.float32) - p2.astype(jnp.float32)))
    assert jnp.allclose(out2, ref2, rtol=1e-5, atol=1e-6), (out2, ref2)

    print("KERNEL_OK")
</pallas_src>

<mosaic_0001>
module attributes {stable_mosaic.version = 11 : i64} {
  func.func @_l1_partial_kernel(%arg0: i32, %arg1: i32, %arg2: memref<8x1024xf32, #tpu.memory_space<vmem>>, %arg3: memref<8x1024xf32, #tpu.memory_space<vmem>>, %arg4: memref<8x1024xf32, #tpu.memory_space<vmem>>) attributes {dimension_semantics = [#tpu.dimension_semantics<parallel>, #tpu.dimension_semantics<arbitrary>], iteration_bounds = array<i64: 1, 1>, scalar_prefetch = 0 : i64, scratch_operands = 0 : i64, tpu.core_type = #tpu.core_type<tc>, window_params = [{transform_indices = @transform_0, window_bounds = array<i64: 8, 1024>}, {transform_indices = @transform_1, window_bounds = array<i64: 8, 1024>}, {transform_indices = @transform_2, window_bounds = array<i64: 8, 1024>}]} {
    %c0_i32 = arith.constant 0 : i32
    %0 = arith.cmpi eq, %arg1, %c0_i32 : i32
    %1 = arith.extui %0 : i1 to i32
    %c0_i32_0 = arith.constant 0 : i32
    %2 = arith.cmpi ne, %1, %c0_i32_0 : i32
    scf.if %2 {
      %cst_8 = arith.constant 0.000000e+00 : f32
      %12 = vector.broadcast %cst_8 : f32 to vector<8x1024xf32>
      %c0_9 = arith.constant 0 : index
      %c0_10 = arith.constant 0 : index
      %13 = vector.load %arg4[%c0_9, %c0_10] : memref<8x1024xf32, #tpu.memory_space<vmem>>, vector<8x1024xf32>
      tpu.vector_store %arg4[%c0_9, %c0_10], %12 {strides = array<i32>} : memref<8x1024xf32, #tpu.memory_space<vmem>>, vector<8x1024xf32>,
    } else {
    }
    %c0 = arith.constant 0 : index
    %c0_1 = arith.constant 0 : index
    %3 = vector.load %arg2[%c0, %c0_1] : memref<8x1024xf32, #tpu.memory_space<vmem>>, vector<8x1024xf32>
    %c0_2 = arith.constant 0 : index
    %c0_3 = arith.constant 0 : index
    %4 = vector.load %arg3[%c0_2, %c0_3] : memref<8x1024xf32, #tpu.memory_space<vmem>>, vector<8x1024xf32>
    %5 = arith.subf %3, %4 : vector<8x1024xf32>
    %6 = math.absf %5 : vector<8x1024xf32>
    %c0_4 = arith.constant 0 : index
    %c0_5 = arith.constant 0 : index
    %7 = vector.load %arg4[%c0_4, %c0_5] : memref<8x1024xf32, #tpu.memory_space<vmem>>, vector<8x1024xf32>
    %8 = vector.shape_cast %6 : vector<8x1024xf32> to vector<1x8x1024xf32>
    %cst = arith.constant dense<0.000000e+00> : vector<8x1024xf32>
    %9 = vector.multi_reduction <add>, %8, %cst [0] : vector<1x8x1024xf32> to vector<8x1024xf32>
    %10 = arith.addf %7, %9 : vector<8x1024xf32>
    %c0_6 = arith.constant 0 : index
    %c0_7 = arith.constant 0 : index
    %11 = vector.load %arg4[%c0_6, %c0_7] : memref<8x1024xf32, #tpu.memory_space<vmem>>, vector<8x1024xf32>
    tpu.vector_store %arg4[%c0_6, %c0_7], %10 {strides = array<i32>} : memref<8x1024xf32, #tpu.memory_space<vmem>>, vector<8x1024xf32>,
    return
  }
  func.func @transform_0(%arg0: i32, %arg1: i32) -> (i32, i32) {
    %c1_i32 = arith.constant 1 : i32
    %0 = arith.muli %arg0, %c1_i32 : i32
    %1 = arith.addi %0, %arg1 : i32
    %c0_i32 = arith.constant 0 : i32
    %2 = arith.minsi %1, %c0_i32 : i32
    %c0_i32_0 = arith.constant 0 : i32
    %c0_i32_1 = arith.constant 0 : i32
    return %2, %c0_i32_0 : i32, i32
  }
  func.func @transform_1(%arg0: i32, %arg1: i32) -> (i32, i32) {
    %c1_i32 = arith.constant 1 : i32
    %0 = arith.muli %arg0, %c1_i32 : i32
    %1 = arith.addi %0, %arg1 : i32
    %c0_i32 = arith.constant 0 : i32
    %2 = arith.minsi %1, %c0_i32 : i32
    %c0_i32_0 = arith.constant 0 : i32
    %c0_i32_1 = arith.constant 0 : i32
    return %2, %c0_i32_0 : i32, i32
  }
  func.func @transform_2(%arg0: i32, %arg1: i32) -> (i32, i32) {
    %c0_i32 = arith.constant 0 : i32
    %c0_i32_0 = arith.constant 0 : i32
    return %arg0, %c0_i32 : i32, i32
  }
}

</mosaic_0001>

<bundles_post_ra>
// kernel: tpu_custom_call.1
= control target key start
LH: loop header
LB: loop body
LE: loop exit
PB: predicated region body
PF: predicated region fallthrough
CT: control target
= control target key end

     0   :  { %7 = vsyncpa [#allocation3], 0  ;;  %s280_s0 = inlined_call_operand.hbm [shape: f32[8,1024], index: 0, kind: input, shape index: {}]   ;;  %s281_s1 = inlined_call_operand.hbm [shape: f32[8,1024], index: 1, kind: input, shape index: {}]   ;;  %s282_s2 = inlined_call_operand.hbm [shape: f32[8,1024], index: 2, kind: output, shape index: {}]  }
   0x1   :  { %8 = vsyncpa [#allocation6], 0 }
   0x2   :  { %9 = vsyncpa [#allocation4], 0  ;;  %s226_s9 = smov [#allocation2]   ;;  %s227_s11 = smov [#allocation5]  }
   0x3   :  { %s22_s10 = sshll.u32 %s226_s9, 4  ;;  %s38_s12 = sshll.u32 %s227_s11, 4  ;;  %s23_s10 = int_to_ptr.vmem [resolvable:$true] %s22_s10  ;;  %s39_s12 = int_to_ptr.vmem [resolvable:$true] %s38_s12 }
   0x4   :  { %s154_s15 = scalar_lea.hbm %s280_s0, 1024 }
   0x5   :  { %p155_p0 = scmp.ne.s32.totalorder %s280_s0, %s154_s15  ;;  %p158_p1 = scmp.lt.u32.totalorder %s154_s15, %s280_s0 }
   0x7   :  { %p160_p2 = pnand %p158_p1, %p155_p0 }
   0x9   :  { %163 = shalt.err (!%p160_p2)
}
   0xa   :  { %s164_s20 = scalar_lea.vmem %s23_s10, 1024  ;;  %p169_p4 = scmp.lt.s32.totalorder %s23_s10, %s23_s10 }
   0xb   :  { %p165_p3 = scmp.ne.s32.totalorder %s23_s10, %s164_s20  ;;  %p170_p5 = scmp.lt.s32.totalorder %s164_s20, %s164_s20 }
   0xd   :  { %p171_p6 = por %p170_p5, %p169_p4 }
   0xf   :  { %p172_p7 = pnand %p171_p6, %p165_p3 }
  0x11   :  { %175 = shalt.err (!%p172_p7)
}
  0x12   :  { %25 = dma.hbm_to_vmem [thread:$0]  %s280_s0, 1024, %s23_s10, [#allocation3]  }
  0x13   :  { %s176_s25 = scalar_lea.hbm %s281_s1, 1024 }
  0x14   :  { %p177_p8 = scmp.ne.s32.totalorder %s281_s1, %s176_s25  ;;  %p180_p9 = scmp.lt.u32.totalorder %s176_s25, %s281_s1 }
  0x16   :  { %p182_p10 = pnand %p180_p9, %p177_p8 }
  0x18   :  { %185 = shalt.err (!%p182_p10)
}
  0x19   :  { %s186_s30 = scalar_lea.vmem %s39_s12, 1024  ;;  %p191_p12 = scmp.lt.s32.totalorder %s39_s12, %s39_s12 }
  0x1a   :  { %p187_p11 = scmp.ne.s32.totalorder %s39_s12, %s186_s30  ;;  %p192_p13 = scmp.lt.s32.totalorder %s186_s30, %s186_s30 }
  0x1c   :  { %p193_p0 = por %p192_p13, %p191_p12 }
  0x1e   :  { %p194_p1 = pnand %p193_p0, %p187_p11 }
  0x20   :  { %197 = shalt.err (!%p194_p1)
}
  0x21   :  { %41 = dma.hbm_to_vmem [thread:$0]  %s281_s1, 1024, %s39_s12, [#allocation6]  }
  0x22   :  { %220 = dma.done.wait [#allocation3], 1024  }
  0x23   :  { %221 = vsyncadd [#allocation3], 4294966272 }
  0x24   :  { %222 = dma.done.wait [#allocation6], 1024  }
  0x25   :  { %223 = vsyncadd [#allocation6], 4294966272  ;;  %v66_v0 = vld [vmem:[#allocation2] sm:$0xff]  ;;  %v67_v2 = vld [vmem:[#allocation2 + $0x8] sm:$0xff]  ;;  %s228_s1 = smov [#allocation7]  }
  0x26   :  { %v74_v1 = vld [vmem:[#allocation5] sm:$0xff]  ;;  %v75_v4 = vld [vmem:[#allocation5 + $0x8] sm:$0xff]  ;;  %v68_v5 = vld [vmem:[#allocation2 + $0x10] sm:$0xff]  ;;  %s136_s4 = sshll.u32 %s228_s1, 4  ;;  %s137_s4 = int_to_ptr.vmem [resolvable:$true] %s136_s4 }
  0x27   :  { %v82_v3 = vsub.f32 %v66_v0, %v74_v1  ;;  %v76_v6 = vld [vmem:[#allocation5 + $0x10] sm:$0xff]  ;;  %v83_v7 = vsub.f32 %v67_v2, %v75_v4  ;;  %v69_v9 = vld [vmem:[#allocation2 + $0x18] sm:$0xff]  ;;  %v70_v11 = vld [vmem:[#allocation2 + $0x20] sm:$0xff]  ;;  %s198_s5 = scalar_lea.vmem %s137_s4, 1024  ;;  %p203_p3 = scmp.lt.s32.totalorder %s137_s4, %s137_s4 }
  0x28   :  { %v84_v8 = vsub.f32 %v68_v5, %v76_v6  ;;  %v77_v10 = vld [vmem:[#allocation5 + $0x18] sm:$0xff]  ;;  %v78_v14 = vld [vmem:[#allocation5 + $0x20] sm:$0xff]  ;;  %v71_v15 = vld [vmem:[#allocation2 + $0x28] sm:$0xff]  ;;  %p199_p2 = scmp.ne.s32.totalorder %s137_s4, %s198_s5  ;;  %p204_p4 = scmp.lt.s32.totalorder %s198_s5, %s198_s5 }
  0x29   :  { %v90_v12 = vand.u32 2147483647, %v82_v3  ;;  %v85_v13 = vsub.f32 %v69_v9, %v77_v10  ;;  %v79_v16 = vld [vmem:[#allocation5 + $0x28] sm:$0xff]  ;;  %v91_v17 = vand.u32 2147483647, %v83_v7  ;;  %v86_v19 = vsub.f32 %v70_v11, %v78_v14  ;;  %v72_v21 = vld [vmem:[#allocation2 + $0x30] sm:$0xff] }
  0x2a   :  { %v92_v18 = vand.u32 2147483647, %v84_v8  ;;  %v87_v20 = vsub.f32 %v71_v15, %v79_v16  ;;  %v80_v22 = vld [vmem:[#allocation5 + $0x30] sm:$0xff]  ;;  %v73_v25 = vld [vmem:[#allocation2 + $0x38] sm:$0xff]  ;;  %p205_p5 = por %p204_p4, %p203_p3 }
  0x2b   :  { %v93_v23 = vand.u32 2147483647, %v85_v13  ;;  %v88_v24 = vsub.f32 %v72_v21, %v80_v22  ;;  %v81_v26 = vld [vmem:[#allocation5 + $0x38] sm:$0xff]  ;;  %v94_v27 = vand.u32 2147483647, %v86_v19  ;;  %122 = vst [vmem:[#allocation7] sm:$0xff] %v90_v12 }
  0x2c   :  { %v95_v28 = vand.u32 2147483647, %v87_v20  ;;  %v89_v30 = vsub.f32 %v73_v25, %v81_v26  ;;  %123 = vst [vmem:[#allocation7 + $0x8] sm:$0xff] %v91_v17  ;;  %124 = vst [vmem:[#allocation7 + $0x10] sm:$0xff] %v92_v18  ;;  %p206_p6 = pnand %p205_p5, %p199_p2 }
  0x2d   :  { %v96_v29 = vand.u32 2147483647, %v88_v24  ;;  %125 = vst [vmem:[#allocation7 + $0x18] sm:$0xff] %v93_v23  ;;  %126 = vst [vmem:[#allocation7 + $0x20] sm:$0xff] %v94_v27 }
  0x2e   :  { %v97_v31 = vand.u32 2147483647, %v89_v30  ;;  %127 = vst [vmem:[#allocation7 + $0x28] sm:$0xff] %v95_v28 }
  0x2f   :  { %128 = vst [vmem:[#allocation7 + $0x30] sm:$0xff] %v96_v29 }
  0x30   :  { %129 = vst [vmem:[#allocation7 + $0x38] sm:$0xff] %v97_v31 }
  0x31   :  { %209 = shalt.err (!%p206_p6)
}
  0x32   :  { %s210_s8 = scalar_lea.hbm %s282_s2, 1024 }
  0x33   :  { %p211_p7 = scmp.ne.s32.totalorder %s282_s2, %s210_s8  ;;  %p214_p8 = scmp.lt.u32.totalorder %s210_s8, %s282_s2 }
  0x35   :  { %p216_p9 = pnand %p214_p8, %p211_p7 }
  0x37   :  { %219 = shalt.err (!%p216_p9)
}
  0x38   :  { %139 = dma.vmem_to_hbm [thread:$0]  %s137_s4, 1024, %s282_s2, [#allocation4]  }
  0x39   :  { %224 = dma.done.wait [#allocation4], 1024  }
  0x3a   :  { %225 = vsyncadd [#allocation4], 4294966272 }
  0x3b   :  { %143 = vsyncpa [#allocation3], 1 }
  0x3c   :  { %144 = vsyncpa [#allocation6], 1 }
  0x3d   :  { %145 = vsyncpa [#allocation4], 1 }

</bundles_post_ra>
